<compile_context>
chip_gen: v6e
topology: v6e:2x2x1
jax: 0.10.0
libtpu: 0.0.40
codegen_flags: <defaults>
</compile_context>

<pallas_src>
import jax
import jax.numpy as jnp
from jax.experimental import pallas as pl
from jax.experimental.pallas import tpu as pltpu


def _softq_kernel(x_ref, w1_ref, b1_ref, w2_ref, b2_ref, w3_ref, b3_ref, o_ref):
    # Layer 1: [TB, d_in] @ [d_in, H] on the MXU (bf16 in, f32 accumulate).
    h1 = jnp.dot(x_ref[...], w1_ref[...], preferred_element_type=jnp.float32)
    h1 = jnp.maximum(h1 + b1_ref[...], 0.0)                    # bias+ReLU in f32

    # Layer 2: the dominant [TB, H] @ [H, H] matmul; recast h1 to bf16 for the
    # MXU, accumulate in f32, epilogue in f32.
    h2 = jnp.dot(h1.astype(w2_ref.dtype), w2_ref[...],
                 preferred_element_type=jnp.float32)
    h2 = jnp.maximum(h2 + b2_ref[...], 0.0)

    # Layer 3: N=1 output -> VPU multiply + XLU lane reduce (f32) instead of an
    # MXU matmul that would waste all but one output column. b3 is SMEM scalar.
    q = jnp.sum(h2 * w3_ref[...], axis=-1, keepdims=True) + b3_ref[0, 0]
    # TODO(synk): if the vst slot ever saturates at very large B, emit a
    # lane-dense (num_tiles, TB) output and reshape to (B, 1) outside.
    o_ref[...] = q.astype(o_ref.dtype)                         # [TB, 1]


def _round_up(x, m):
    return pl.cdiv(x, m) * m


def _choose_batch_tile(B, batch_tile):
    """Batch tile: whole batch for small B, else a 256-aligned tile with >=2
    grid steps (so v7x's second TensorCore gets work on the parallel axis)."""
    if B <= 256:
        return B
    batch_tile = max(256, (batch_tile // 256) * 256)
    half = _round_up(pl.cdiv(B, 2), 256)
    return min(batch_tile, half)


def softq_forward(state, action, params, *, batch_tile=4096,
                  compute_dtype=jnp.bfloat16):
    """Fused SoftQ forward. state: [B, num_inputs], action: [B, num_actions]."""
    w1, b1, w2, b2, w3_row, b3 = params
    d_in, H = w1.shape
    B = state.shape[0]

    # Tiny XLA-level concat (B x d_in copy); MXU operands cast to bf16, the
    # f32 pieces (biases, w3 row, b3) stay f32 for the VPU/XLU epilogue.
    x = jnp.concatenate(
        [state.astype(jnp.float32), action.astype(jnp.float32)], axis=1)
    assert x.shape[1] == d_in
    x = x.astype(compute_dtype)
    w1c = w1.astype(compute_dtype)
    w2c = w2.astype(compute_dtype)
    b1 = b1.astype(jnp.float32)
    b2 = b2.astype(jnp.float32)
    w3_row = w3_row.astype(jnp.float32)
    b3 = b3.astype(jnp.float32)

    TB = _choose_batch_tile(B, batch_tile)
    grid = (pl.cdiv(B, TB),)

    # Constant block index => weights/biases stay resident in VMEM across the
    # grid (DMA'd once).  (pipeline_mode=pl.Buffered(1) would drop their second
    # buffer; skipped — negligible at H=256.)
    res = lambda shape: pl.BlockSpec(shape, lambda i: (0, 0))

    out = pl.pallas_call(
        _softq_kernel,
        out_shape=jax.ShapeDtypeStruct((B, 1), jnp.float32),
        grid=grid,
        in_specs=[
            pl.BlockSpec((TB, d_in), lambda i: (i, 0)),         # x tile (bf16)
            res((d_in, H)),                                     # W1  (bf16, resident)
            res((1, H)),                                        # b1  (f32)
            res((H, H)),                                        # W2  (bf16, resident)
            res((1, H)),                                        # b2  (f32)
            res((1, H)),                                        # w3 row (f32)
            pl.BlockSpec(memory_space=pltpu.MemorySpace.SMEM),  # b3 scalar
        ],
        out_specs=pl.BlockSpec((TB, 1), lambda i: (i, 0)),
        compiler_params=pltpu.CompilerParams(
            dimension_semantics=("parallel",),
            vmem_limit_bytes=32 * 1024 * 1024,
        ),
    )(x, w1c, b1, w2c, b2, w3_row, b3)
    return out


def init_params(key, num_inputs, num_actions, hidden_size=256, init_w=0.003):
    """Deterministic init mirroring the PyTorch module's __init__ shapes/dists."""
    d_in = num_inputs + num_actions
    k1, k2, k3, k4, k5, k6 = jax.random.split(key, 6)

    def torch_default(kw, kb, fan_in, fan_out):
        # nn.Linear default: U(-1/sqrt(fan_in), 1/sqrt(fan_in)) for weight/bias.
        bound = 1.0 / jnp.sqrt(jnp.float32(fan_in))
        w = jax.random.uniform(kw, (fan_in, fan_out), jnp.float32, -bound, bound)
        b = jax.random.uniform(kb, (1, fan_out), jnp.float32, -bound, bound)
        return w, b

    w1, b1 = torch_default(k1, k2, d_in, hidden_size)
    w2, b2 = torch_default(k3, k4, hidden_size, hidden_size)
    # linear3: weight/bias ~ U(-init_w, init_w); weight kept as a [1, H] row.
    w3_row = jax.random.uniform(k5, (1, hidden_size), jnp.float32, -init_w, init_w)
    b3 = jax.random.uniform(k6, (1, 1), jnp.float32, -init_w, init_w)
    return (w1, b1, w2, b2, w3_row, b3)


def reference_forward(state, action, params):
    """Pure-JAX f32 reference matching the PyTorch module."""
    w1, b1, w2, b2, w3_row, b3 = params
    x = jnp.concatenate([state, action], axis=1)
    h1 = jnp.maximum(x @ w1 + b1, 0.0)
    h2 = jnp.maximum(h1 @ w2 + b2, 0.0)
    return h2 @ w3_row.T + b3


if __name__ == "__main__":
    key = jax.random.PRNGKey(0)

    def run_case(case_key, B, num_inputs, num_actions, hidden):
        kp, ks, ka = jax.random.split(case_key, 3)
        params = init_params(kp, num_inputs, num_actions, hidden_size=hidden)
        state = jax.random.normal(ks, (B, num_inputs), jnp.float32)
        action = jax.random.normal(ka, (B, num_actions), jnp.float32)

        q = jax.block_until_ready(softq_forward(state, action, params))
        q_ref = reference_forward(state, action, params)

        assert q.shape == (B, 1), q.shape
        assert bool(jnp.all(jnp.isfinite(q))), "non-finite Q values"
        # bf16 MXU inputs with f32 accumulation -> loosened tolerance vs f32 ref.
        assert bool(jnp.allclose(q, q_ref, atol=1e-2, rtol=5e-2)), (
            B, num_inputs, num_actions, hidden,
            float(jnp.max(jnp.abs(q - q_ref))))

    k1, k2 = jax.random.split(key)
    # Small demo shapes (single-tile path).
    run_case(k1, B=8, num_inputs=16, num_actions=8, hidden=32)
    # Production-ish config: H=256, multi-tile grid with a ragged last tile
    # (B not a multiple of TB) to exercise padded-block handling.
    run_case(k2, B=1000, num_inputs=17, num_actions=6, hidden=256)

    print("KERNEL_OK")
</pallas_src>

<mosaic_0001>
module attributes {stable_mosaic.version = 11 : i64} {
  func.func @_softq_kernel(%arg0: i32, %arg1: memref<8x24xbf16, #tpu.memory_space<vmem>>, %arg2: memref<24x32xbf16, #tpu.memory_space<vmem>>, %arg3: memref<1x32xf32, #tpu.memory_space<vmem>>, %arg4: memref<32x32xbf16, #tpu.memory_space<vmem>>, %arg5: memref<1x32xf32, #tpu.memory_space<vmem>>, %arg6: memref<1x32xf32, #tpu.memory_space<vmem>>, %arg7: memref<1x1xf32, #tpu.memory_space<smem>>, %arg8: memref<8x1xf32, #tpu.memory_space<vmem>>) attributes {dimension_semantics = [#tpu.dimension_semantics<parallel>], iteration_bounds = array<i64: 1>, scalar_prefetch = 0 : i64, scratch_operands = 0 : i64, tpu.core_type = #tpu.core_type<tc>, window_params = [{transform_indices = @transform_0, window_bounds = array<i64: 8, 24>}, {pipeline_mode = #tpu.pipeline_mode<synchronous>, transform_indices = @transform_1, window_bounds = array<i64: 24, 32>}, {pipeline_mode = #tpu.pipeline_mode<synchronous>, transform_indices = @transform_2, window_bounds = array<i64: 1, 32>}, {pipeline_mode = #tpu.pipeline_mode<synchronous>, transform_indices = @transform_3, window_bounds = array<i64: 32, 32>}, {pipeline_mode = #tpu.pipeline_mode<synchronous>, transform_indices = @transform_4, window_bounds = array<i64: 1, 32>}, {pipeline_mode = #tpu.pipeline_mode<synchronous>, transform_indices = @transform_5, window_bounds = array<i64: 1, 32>}, {transform_indices = @transform_6, window_bounds = array<i64: 1, 1>}, {transform_indices = @transform_7, window_bounds = array<i64: 8, 1>}]} {
    %c0 = arith.constant 0 : index
    %c0_0 = arith.constant 0 : index
    %0 = vector.load %arg1[%c0, %c0_0] : memref<8x24xbf16, #tpu.memory_space<vmem>>, vector<8x24xbf16>
    %c0_1 = arith.constant 0 : index
    %c0_2 = arith.constant 0 : index
    %1 = vector.load %arg2[%c0_1, %c0_2] : memref<24x32xbf16, #tpu.memory_space<vmem>>, vector<24x32xbf16>
    %cst = arith.constant dense<0.000000e+00> : vector<8x32xf32>
    %2 = tpu.matmul %0, %1, %cst {dimension_numbers = #tpu.dot_dimension_numbers<[1], [0], [0], [1], [0, 0, 1, 1], [], []>} : vector<8x24xbf16>, vector<24x32xbf16>, vector<8x32xf32> -> vector<8x32xf32>
    %c0_3 = arith.constant 0 : index
    %c0_4 = arith.constant 0 : index
    %3 = vector.load %arg3[%c0_3, %c0_4] : memref<1x32xf32, #tpu.memory_space<vmem>>, vector<1x32xf32>
    %4 = vector.broadcast %3 : vector<1x32xf32> to vector<8x32xf32>
    %5 = arith.addf %2, %4 : vector<8x32xf32>
    %cst_5 = arith.constant 0.000000e+00 : f32
    %6 = vector.broadcast %cst_5 : f32 to vector<8x32xf32>
    %7 = arith.maximumf %5, %6 : vector<8x32xf32>
    %8 = arith.truncf %7 : vector<8x32xf32> to vector<8x32xbf16>
    %c0_6 = arith.constant 0 : index
    %c0_7 = arith.constant 0 : index
    %9 = vector.load %arg4[%c0_6, %c0_7] : memref<32x32xbf16, #tpu.memory_space<vmem>>, vector<32x32xbf16>
    %cst_8 = arith.constant dense<0.000000e+00> : vector<8x32xf32>
    %10 = tpu.matmul %8, %9, %cst_8 {dimension_numbers = #tpu.dot_dimension_numbers<[1], [0], [0], [1], [0, 0, 1, 1], [], []>} : vector<8x32xbf16>, vector<32x32xbf16>, vector<8x32xf32> -> vector<8x32xf32>
    %c0_9 = arith.constant 0 : index
    %c0_10 = arith.constant 0 : index
    %11 = vector.load %arg5[%c0_9, %c0_10] : memref<1x32xf32, #tpu.memory_space<vmem>>, vector<1x32xf32>
    %12 = vector.broadcast %11 : vector<1x32xf32> to vector<8x32xf32>
    %13 = arith.addf %10, %12 : vector<8x32xf32>
    %cst_11 = arith.constant 0.000000e+00 : f32
    %14 = vector.broadcast %cst_11 : f32 to vector<8x32xf32>
    %15 = arith.maximumf %13, %14 : vector<8x32xf32>
    %c0_12 = arith.constant 0 : index
    %c0_13 = arith.constant 0 : index
    %16 = vector.load %arg6[%c0_12, %c0_13] : memref<1x32xf32, #tpu.memory_space<vmem>>, vector<1x32xf32>
    %17 = vector.broadcast %16 : vector<1x32xf32> to vector<8x32xf32>
    %18 = arith.mulf %15, %17 : vector<8x32xf32>
    %cst_14 = arith.constant dense<0.000000e+00> : vector<8xf32>
    %19 = vector.multi_reduction <add>, %18, %cst_14 [1] : vector<8x32xf32> to vector<8xf32>
    %20 = vector.shape_cast %19 : vector<8xf32> to vector<8x1xf32>
    %c0_15 = arith.constant 0 : index
    %c0_16 = arith.constant 0 : index
    %21 = memref.load %arg7[%c0_15, %c0_16] : memref<1x1xf32, #tpu.memory_space<smem>>
    %22 = vector.broadcast %21 : f32 to vector<8x1xf32>
    %23 = arith.addf %20, %22 : vector<8x1xf32>
    %c0_17 = arith.constant 0 : index
    %c0_18 = arith.constant 0 : index
    %24 = vector.load %arg8[%c0_17, %c0_18] : memref<8x1xf32, #tpu.memory_space<vmem>>, vector<8x1xf32>
    tpu.vector_store %arg8[%c0_17, %c0_18], %23 {strides = array<i32>} : memref<8x1xf32, #tpu.memory_space<vmem>>, vector<8x1xf32>,
    return
  }
  func.func @transform_0(%arg0: i32) -> (i32, i32) {
    %c0_i32 = arith.constant 0 : i32
    %c0_i32_0 = arith.constant 0 : i32
    return %arg0, %c0_i32 : i32, i32
  }
  func.func @transform_1(%arg0: i32) -> (i32, i32) {
    %c0_i32 = arith.constant 0 : i32
    %c0_i32_0 = arith.constant 0 : i32
    %c0_i32_1 = arith.constant 0 : i32
    return %c0_i32, %c0_i32_0 : i32, i32
  }
  func.func @transform_2(%arg0: i32) -> (i32, i32) {
    %c0_i32 = arith.constant 0 : i32
    %c0_i32_0 = arith.constant 0 : i32
    %c0_i32_1 = arith.constant 0 : i32
    return %c0_i32, %c0_i32_0 : i32, i32
  }
  func.func @transform_3(%arg0: i32) -> (i32, i32) {
    %c0_i32 = arith.constant 0 : i32
    %c0_i32_0 = arith.constant 0 : i32
    %c0_i32_1 = arith.constant 0 : i32
    return %c0_i32, %c0_i32_0 : i32, i32
  }
  func.func @transform_4(%arg0: i32) -> (i32, i32) {
    %c0_i32 = arith.constant 0 : i32
    %c0_i32_0 = arith.constant 0 : i32
    %c0_i32_1 = arith.constant 0 : i32
    return %c0_i32, %c0_i32_0 : i32, i32
  }
  func.func @transform_5(%arg0: i32) -> (i32, i32) {
    %c0_i32 = arith.constant 0 : i32
    %c0_i32_0 = arith.constant 0 : i32
    %c0_i32_1 = arith.constant 0 : i32
    return %c0_i32, %c0_i32_0 : i32, i32
  }
  func.func @transform_6(%arg0: i32) -> (i32, i32) {
    %c0_i32 = arith.constant 0 : i32
    %c0_i32_0 = arith.constant 0 : i32
    %c0_i32_1 = arith.constant 0 : i32
    return %c0_i32, %c0_i32_0 : i32, i32
  }
  func.func @transform_7(%arg0: i32) -> (i32, i32) {
    %c0_i32 = arith.constant 0 : i32
    %c0_i32_0 = arith.constant 0 : i32
    return %arg0, %c0_i32 : i32, i32
  }
}

</mosaic_0001>

<bundles_post_ra>
// kernel: tpu_custom_call.1
= control target key start
LH: loop header
LB: loop body
LE: loop exit
PB: predicated region body
PF: predicated region fallthrough
CT: control target
= control target key end

     0   :  { %13 = vsyncpa [#allocation4], 0  ;;  %s404_s0 = inlined_call_operand.hbm [shape: bf16[8,24], index: 0, kind: input, shape index: {}]   ;;  %s405_s1 = inlined_call_operand.hbm [shape: bf16[24,32], index: 1, kind: input, shape index: {}]   ;;  %s406_s2 = inlined_call_operand.vmem [shape: f32[1,32], index: 2, kind: input, shape index: {}]   ;;  %s407_s3 = inlined_call_operand.hbm [shape: bf16[32,32], index: 3, kind: input, shape index: {}]   ;;  %s408_s4 = inlined_call_operand.vmem [shape: f32[1,32], index: 4, kind: input, shape index: {}]   ;;  %s409_s5 = inlined_call_operand.vmem [shape: f32[1,32], index: 5, kind: input, shape index: {}]   ;;  %s410_s6 = inlined_call_operand.<no memory space> [shape: f32[1,1], index: 6, kind: input, shape index: {}]   ;;  %s411_s7 = inlined_call_operand.vmem [shape: f32[8,1], index: 7, kind: output, shape index: {}]  }
   0x1   :  { %14 = vsyncpa [#allocation6], 0  ;;  %s333_s24 = smov [#allocation5]  }
   0x2   :  { %s30_s25 = sshll.u32 %s333_s24, 4  ;;  %s31_s25 = int_to_ptr.vmem [resolvable:$true] %s30_s25 }
   0x3   :  { %s277_s26 = scalar_lea.vmem %s31_s25, 192  ;;  %p282_p1 = scmp.lt.s32.totalorder %s31_s25, %s31_s25 }
   0x4   :  { %p278_p0 = scmp.ne.s32.totalorder %s31_s25, %s277_s26  ;;  %p283_p2 = scmp.lt.s32.totalorder %s277_s26, %s277_s26 }
   0x6   :  { %p284_p3 = por %p283_p2, %p282_p1 }
   0x8   :  { %p285_p4 = pnand %p284_p3, %p278_p0 }
   0xa   :  { %288 = shalt.err (!%p285_p4)
}
   0xb   :  { %s334_s27 = smov 64   ;;  %s335_s28 = smov 4  }
   0xc   :  { %36 = dma.hbm_to_vmem [thread:$0]  %s405_s1, 192, %s31_s25, [#allocation6], %s334_s27, %s334_s27, %s335_s28  }
   0xd   :  { %s336_s8 = smov [#allocation3]   ;;  %s337_s10 = smov [#allocation7]  }
   0xe   :  { %s21_s9 = sshll.u32 %s336_s8, 4  ;;  %s44_s11 = sshll.u32 %s337_s10, 4  ;;  %s22_s9 = int_to_ptr.vmem [resolvable:$true] %s21_s9  ;;  %s45_s11 = int_to_ptr.vmem [resolvable:$true] %s44_s11 }
   0xf   :  { %s297_s12 = scalar_lea.vmem %s22_s9, 64  ;;  %p302_p6 = scmp.lt.s32.totalorder %s22_s9, %s22_s9 }
  0x10   :  { %p298_p5 = scmp.ne.s32.totalorder %s22_s9, %s297_s12  ;;  %p303_p7 = scmp.lt.s32.totalorder %s297_s12, %s297_s12 }
  0x12   :  { %p304_p8 = por %p303_p7, %p302_p6 }
  0x14   :  { %p305_p9 = pnand %p304_p8, %p298_p5 }
  0x16   :  { %308 = shalt.err (!%p305_p9)
}
  0x17   :  { %24 = dma.hbm_to_vmem [thread:$0]  %s404_s0, 64, %s22_s9, [#allocation4]  }
  0x18   :  { %s317_s15 = scalar_lea.vmem %s45_s11, 256  ;;  %p322_p11 = scmp.lt.s32.totalorder %s45_s11, %s45_s11 }
  0x19   :  { %p318_p10 = scmp.ne.s32.totalorder %s45_s11, %s317_s15  ;;  %p323_p12 = scmp.lt.s32.totalorder %s317_s15, %s317_s15 }
  0x1b   :  { %p324_p13 = por %p323_p12, %p322_p11 }
  0x1d   :  { %p325_p0 = pnand %p324_p13, %p318_p10 }
  0x1f   :  { %328 = shalt.err (!%p325_p0)
}
  0x20   :  { %50 = dma.hbm_to_vmem [thread:$0]  %s407_s3, 256, %s45_s11, [#allocation6], %s334_s27, %s334_s27, %s335_s28  }
  0x21   :  { %329 = dma.done.wait [#allocation4], 64  }
  0x22   :  { %330 = vsyncadd [#allocation4], 4294967232 }
  0x23   :  { %331 = dma.done.wait [#allocation6], 448  }
  0x24   :  { %332 = vsyncadd [#allocation6], 4294966848  ;;  %v338_v0 = vmov 0.0   ;;  %vm339_vm0 = vmmov 0   ;;  %vm91_vm1 = vcmask 1043456   ;;  %v266_v3 = vld [vmem:[#allocation5] sm:$0xff]   ;;  %v217_v25 = vstv %s410_s6 }
  0x25   :  { %242 = vmatprep.subr.bf16.mxu0 %v338_v0  ;;  %246 = vmatprep.mubr.msk.bf16.mxu0 %vm339_vm0, %v338_v0  ;;  %v265_v1 = vld [vmem:[#allocation5 + $0x8] ss:$0 sps:$4 sm:$0xff]   ;;  %v67_v4 = vld [vmem:[#allocation3] sm:$0xf]  ;;  %vm87_vm2 = vcmask 195584   ;;  %v267_v5 = vld [vmem:[#allocation7 + $0x8] sm:$0xff]  }
  0x26   :  { %250 = vmatprep.subr.bf16.mxu1 %v338_v0  ;;  %254 = vmatprep.mubr.msk.bf16.mxu1 %vm339_vm0, %v338_v0  ;;  %v93_v2 = vsel %vm91_vm1, %v265_v1, 0  ;;  %v268_v6 = vld [vmem:[#allocation7] sm:$0xff]   ;;  %v227_v7 = vld [vmem:[%s406_s2] ss:$0 sm:$0xff]  ;;  %vm160_vm3 = vcmask 261120   ;;  %vm219_vm4 = vcmask 7168  }
  0x27   :  { %243 = vmatpush3.bf16.msra.mxu0 %v93_v2  ;;  %251 = vmatpush3.bf16.msra.mxu1 %v267_v5  ;;  %v231_v15 = vld [vmem:[%s408_s4] ss:$0 sm:$0xff] }
  0x28   :  { %244 = vmatprep.subr.bf16.mxu0 %v338_v0  ;;  %252 = vmatprep.subr.bf16.mxu1 %v338_v0  ;;  %v235_v19 = vld [vmem:[%s409_s5] ss:$0 sm:$0xff] }
  0x2b   :  { %245 = vmatpush3.bf16.msra.mxu0 %v266_v3  ;;  %253 = vmatpush3.bf16.msra.mxu1 %v268_v6 }
  0x2e   :  { %247 = vmatmul.mubr.msk.bf16.vlgmr.msra.gmra.mxu0 %vm87_vm2, %v67_v4 }
  0xee   :  { %v129_v8 = vpop.f32.mrf.mxu0 }
  0xef   :  { %v130_v9 = vadd.f32 %v227_v7, %v129_v8 }
  0xf0   :  { %v248_v10 = vpop.f32.mrf.mxu0 }
  0xf1   :  { %v135_v11 = vmax.f32 %v130_v9, 0.0 }
  0xf2   :  { %v132_v12 = vpop.f32.mrf.mxu0 }
  0xf3   :  { %v136_v13 = vpack.c.bf16 %v135_v11, %v135_v11 }
  0xf4   :  { %v249_v14 = vpop.f32.mrf.mxu0 }
  0xf5   :  { %255 = vmatmul.mubr.msk.bf16.vlgmr.msra.gmra.mxu1 %vm160_vm3, %v136_v13 }
 0x1b5   :  { %v198_v16 = vpop.f32.mrf.mxu1 }
 0x1b6   :  { %v199_v17 = vadd.f32 %v231_v15, %v198_v16 }
 0x1b7   :  { %v256_v18 = vpop.f32.mrf.mxu1 }
 0x1b8   :  { %v204_v20 = vmax.f32 %v199_v17, 0.0 }
 0x1b9   :  { %v201_v21 = vpop.f32.mrf.mxu1 }
 0x1ba   :  { %v212_v22 = vmul.f32 %v235_v19, %v204_v20 }
 0x1bb   :  { %v257_v23 = vpop.f32.mrf.mxu1 }
 0x1bc   :  { %v213_v24 = vsel %vm160_vm3, %v212_v22, 0.0 }
 0x1bd   :  { %214 = vadd.xlane.f32.xlu0 %v213_v24 }
 0x246   :  { %v215_v26 = vpop.xlane.xlu0 %214 }
 0x247   :  { %v218_v27 = vadd.f32 %v217_v25, %v215_v26 }
 0x249   :  { %220 = vst.msk [vmem:[%s411_s7] sm:$0xff] %vm219_vm4, %v218_v27 }
 0x24a   :  { %225 = vsyncpa [#allocation4], 1 }
 0x24b   :  { %226 = vsyncpa [#allocation6], 1 }

</bundles_post_ra>
